<compile_context>
chip_gen: v5e
topology: v5e:2x2
jax: 0.10.0
libtpu: 0.0.40
codegen_flags: <defaults>
</compile_context>

<pallas_src>
import functools

import jax
import jax.numpy as jnp
from jax.experimental import pallas as pl
from jax.experimental.pallas import tpu as pltpu


def _mlp_kernel(x_ref, w1_ref, w2_ref, w3_ref, o_ref):
    # x_ref: (TILE_B, 8) block of x in natural (batch, feature) layout.
    # Put the batch on lanes (small XLU transpose) so every intermediate is lane-dense and the
    # output store is an unmasked, lane-dense vst.
    xt = x_ref[...].T                                        # (8, TILE_B)
    ones = jnp.ones((1, xt.shape[1]), dtype=xt.dtype)
    xa = jnp.concatenate([xt, ones], axis=0)                 # (9, TILE_B); constant-1 row folds b1

    # Layer 1: (65, 9) @ (9, TILE_B). Rows 0..63 = [W1 | b1]; row 64 = [0..0, 1] so that after
    # ReLU h1[64, :] == 1, which folds b2 into the next matmul.
    h1 = jnp.maximum(
        jnp.dot(w1_ref[...], xa, preferred_element_type=jnp.float32), 0.0)   # (65, TILE_B)

    # Layer 2: (33, 65) @ (65, TILE_B). Rows 0..31 = [W2 | b2]; row 32 keeps the ones row alive.
    h2 = jnp.maximum(
        jnp.dot(w2_ref[...], h1, preferred_element_type=jnp.float32), 0.0)   # (33, TILE_B)

    # Layer 3 on the MXU (M=1 matmul), b3 folded: (1, 33) @ (33, TILE_B) -> (1, TILE_B).
    z = jnp.dot(w3_ref[...], h2, preferred_element_type=jnp.float32)

    # Exact sigmoid: exp + reciprocal both go to the EUP; the (1, TILE_B) slab is tiny.
    o_ref[...] = 1.0 / (1.0 + jnp.exp(-z))


def _round_up(v, m):
    return (v + m - 1) // m * m


def _augment_params(params):
    """Fold biases into the weights (PyTorch nn.Linear layout: W is (out, in))."""
    f32 = jnp.float32
    w1, b1 = params["w1"].astype(f32), params["b1"].astype(f32)   # (64, 8), (64,)
    w2, b2 = params["w2"].astype(f32), params["b2"].astype(f32)   # (32, 64), (32,)
    w3, b3 = params["w3"].astype(f32), params["b3"].astype(f32)   # (1, 32), (1,)

    def aug(w, b, extra_unit_row):
        wa = jnp.concatenate([w, b[:, None]], axis=1)              # (out, in + 1)
        if extra_unit_row:
            unit = jnp.zeros((1, wa.shape[1]), f32).at[0, -1].set(1.0)
            wa = jnp.concatenate([wa, unit], axis=0)               # (out + 1, in + 1)
        return wa

    return aug(w1, b1, True), aug(w2, b2, True), aug(w3, b3, False)   # (65,9), (33,65), (1,33)


@functools.partial(jax.jit, static_argnames=("max_tile_b",))
def salary_predictor_forward(x, params, *, max_tile_b=16384):
    """x: (B, 8). params: PyTorch-layout weights/biases. Returns (B, 1) float32."""
    B, F = x.shape
    assert F == 8
    x = x.astype(jnp.float32)

    w1a, w2a, w3a = _augment_params(params)

    # Big batch tile (amortizes per-grid-step overhead), capped so realistic batches give >= 2
    # grid steps (v7x two-TensorCore split of the "parallel" axis) and per-step VMEM stays small.
    tile_b = min(max_tile_b, _round_up(pl.cdiv(B, 2), 128))
    if B % tile_b == 0:
        b_pad, x_in = B, x                         # fast path: zero wrapper-side copies of x
    else:
        b_pad = _round_up(B, tile_b)
        x_in = jnp.zeros((b_pad, 8), jnp.float32).at[:B, :].set(x)

    grid = (b_pad // tile_b,)
    const = lambda i: (0, 0)

    cost = pl.CostEstimate(
        flops=2 * B * (65 * 9 + 33 * 65 + 33),
        transcendentals=B,
        bytes_accessed=4 * (x.size + B + w1a.size + w2a.size + w3a.size),
    )

    # The (TILE_B, 8) x block is lane-padded in VMEM (~TILE_B * 512 B per buffer, double-buffered)
    # plus ~TILE_B * 0.5 KiB of intermediates; give the compiler explicit headroom (<= 56 MiB so it
    # also fits v7x's 64 MiB VMEM per TensorCore).
    vmem_limit = int(min(56 * 2**20, max(32 * 2**20, 3 * tile_b * 1024)))

    out = pl.pallas_call(
        _mlp_kernel,
        out_shape=jax.ShapeDtypeStruct((1, b_pad), jnp.float32),
        grid=grid,
        in_specs=[
            pl.BlockSpec((tile_b, 8), lambda i: (i, 0)),   # x: streamed per batch tile
            pl.BlockSpec((65, 9), const),                  # bias-folded weights: resident
            pl.BlockSpec((33, 65), const),
            pl.BlockSpec((1, 33), const),
        ],
        out_specs=pl.BlockSpec((1, tile_b), lambda i: (0, i)),
        compiler_params=pltpu.CompilerParams(
            dimension_semantics=("parallel",),
            vmem_limit_bytes=vmem_limit,
        ),
        cost_estimate=cost,
    )(x_in, w1a, w2a, w3a)

    return out[0, :B].reshape(B, 1)


def init_params(key):
    """Deterministic init matching nn.Linear shapes/semantics: W is (out_features, in_features)."""
    k1, k2, k3, k4, k5, k6 = jax.random.split(key, 6)

    def lin_init(kw, kb, fan_in, fan_out):
        bound = 1.0 / jnp.sqrt(fan_in)
        w = jax.random.uniform(kw, (fan_out, fan_in), jnp.float32, -bound, bound)
        b = jax.random.uniform(kb, (fan_out,), jnp.float32, -bound, bound)
        return w, b

    w1, b1 = lin_init(k1, k2, 8, 64)
    w2, b2 = lin_init(k3, k4, 64, 32)
    w3, b3 = lin_init(k5, k6, 32, 1)
    return {"w1": w1, "b1": b1, "w2": w2, "b2": b2, "w3": w3, "b3": b3}


def reference_forward(x, params):
    h1 = jnp.maximum(x @ params["w1"].T + params["b1"], 0.0)
    h2 = jnp.maximum(h1 @ params["w2"].T + params["b2"], 0.0)
    return jax.nn.sigmoid(h2 @ params["w3"].T + params["b3"])


if __name__ == "__main__":
    key = jax.random.PRNGKey(0)
    kx, kp, kx2 = jax.random.split(key, 3)

    params = init_params(kp)

    # Small batch (matches the module's typical usage).
    x_small = jax.random.normal(kx, (8, 8), dtype=jnp.float32)
    out_small = jax.block_until_ready(salary_predictor_forward(x_small, params))
    ref_small = reference_forward(x_small, params)
    assert out_small.shape == (8, 1)
    assert jnp.allclose(out_small, ref_small, atol=2e-3, rtol=2e-3), \
        float(jnp.max(jnp.abs(out_small - ref_small)))

    # Non-tile-aligned batch: exercises the multi-step grid and the padded tail.
    x_big = jax.random.normal(kx2, (384, 8), dtype=jnp.float32)
    out_big = jax.block_until_ready(salary_predictor_forward(x_big, params))
    ref_big = reference_forward(x_big, params)
    assert out_big.shape == (384, 1)
    assert jnp.allclose(out_big, ref_big, atol=2e-3, rtol=2e-3), \
        float(jnp.max(jnp.abs(out_big - ref_big)))

    print("KERNEL_OK")
</pallas_src>

<mosaic_0001>
module attributes {stable_mosaic.version = 11 : i64} {
  func.func @_mlp_kernel(%arg0: i32, %arg1: memref<128x8xf32, #tpu.memory_space<vmem>>, %arg2: memref<65x9xf32, #tpu.memory_space<vmem>>, %arg3: memref<33x65xf32, #tpu.memory_space<vmem>>, %arg4: memref<1x33xf32, #tpu.memory_space<vmem>>, %arg5: memref<1x128xf32, #tpu.memory_space<vmem>>) attributes {dimension_semantics = [#tpu.dimension_semantics<parallel>], iteration_bounds = array<i64: 1>, scalar_prefetch = 0 : i64, scratch_operands = 0 : i64, tpu.core_type = #tpu.core_type<tc>, window_params = [{transform_indices = @transform_0, window_bounds = array<i64: 128, 8>}, {pipeline_mode = #tpu.pipeline_mode<synchronous>, transform_indices = @transform_1, window_bounds = array<i64: 65, 9>}, {pipeline_mode = #tpu.pipeline_mode<synchronous>, transform_indices = @transform_2, window_bounds = array<i64: 33, 65>}, {pipeline_mode = #tpu.pipeline_mode<synchronous>, transform_indices = @transform_3, window_bounds = array<i64: 1, 33>}, {transform_indices = @transform_4, window_bounds = array<i64: 1, 128>}]} {
    %c0 = arith.constant 0 : index
    %c0_0 = arith.constant 0 : index
    %0 = vector.load %arg1[%c0, %c0_0] : memref<128x8xf32, #tpu.memory_space<vmem>>, vector<128x8xf32>
    %1 = tpu.transpose %0, [1, 0] : vector<128x8xf32> -> vector<8x128xf32>
    %cst = arith.constant 1.000000e+00 : f32
    %2 = vector.broadcast %cst : f32 to vector<1x128xf32>
    %3 = tpu.concatenate %1, %2 in 0 : vector<8x128xf32>, vector<1x128xf32> -> vector<9x128xf32>
    %c0_1 = arith.constant 0 : index
    %c0_2 = arith.constant 0 : index
    %4 = vector.load %arg2[%c0_1, %c0_2] : memref<65x9xf32, #tpu.memory_space<vmem>>, vector<65x9xf32>
    %cst_3 = arith.constant dense<0.000000e+00> : vector<65x128xf32>
    %5 = tpu.matmul %4, %3, %cst_3 {dimension_numbers = #tpu.dot_dimension_numbers<[1], [0], [0], [1], [0, 0, 1, 1], [], []>} : vector<65x9xf32>, vector<9x128xf32>, vector<65x128xf32> -> vector<65x128xf32>
    %cst_4 = arith.constant 0.000000e+00 : f32
    %6 = vector.broadcast %cst_4 : f32 to vector<65x128xf32>
    %7 = arith.maximumf %5, %6 : vector<65x128xf32>
    %c0_5 = arith.constant 0 : index
    %c0_6 = arith.constant 0 : index
    %8 = vector.load %arg3[%c0_5, %c0_6] : memref<33x65xf32, #tpu.memory_space<vmem>>, vector<33x65xf32>
    %cst_7 = arith.constant dense<0.000000e+00> : vector<33x128xf32>
    %9 = tpu.matmul %8, %7, %cst_7 {dimension_numbers = #tpu.dot_dimension_numbers<[1], [0], [0], [1], [0, 0, 1, 1], [], []>} : vector<33x65xf32>, vector<65x128xf32>, vector<33x128xf32> -> vector<33x128xf32>
    %cst_8 = arith.constant 0.000000e+00 : f32
    %10 = vector.broadcast %cst_8 : f32 to vector<33x128xf32>
    %11 = arith.maximumf %9, %10 : vector<33x128xf32>
    %c0_9 = arith.constant 0 : index
    %c0_10 = arith.constant 0 : index
    %12 = vector.load %arg4[%c0_9, %c0_10] : memref<1x33xf32, #tpu.memory_space<vmem>>, vector<1x33xf32>
    %cst_11 = arith.constant dense<0.000000e+00> : vector<1x128xf32>
    %13 = tpu.matmul %12, %11, %cst_11 {dimension_numbers = #tpu.dot_dimension_numbers<[1], [0], [0], [1], [0, 0, 1, 1], [], []>} : vector<1x33xf32>, vector<33x128xf32>, vector<1x128xf32> -> vector<1x128xf32>
    %cst_12 = arith.constant 0.000000e+00 : f32
    %14 = vector.broadcast %cst_12 : f32 to vector<1x128xf32>
    %15 = arith.subf %14, %13 : vector<1x128xf32>
    %16 = math.exp %15 : vector<1x128xf32>
    %cst_13 = arith.constant 1.000000e+00 : f32
    %17 = vector.broadcast %cst_13 : f32 to vector<1x128xf32>
    %18 = arith.addf %17, %16 : vector<1x128xf32>
    %cst_14 = arith.constant 1.000000e+00 : f32
    %19 = vector.broadcast %cst_14 : f32 to vector<1x128xf32>
    %20 = arith.divf %19, %18 : vector<1x128xf32>
    %c0_15 = arith.constant 0 : index
    %c0_16 = arith.constant 0 : index
    %21 = vector.load %arg5[%c0_15, %c0_16] : memref<1x128xf32, #tpu.memory_space<vmem>>, vector<1x128xf32>
    tpu.vector_store %arg5[%c0_15, %c0_16], %20 {strides = array<i32>} : memref<1x128xf32, #tpu.memory_space<vmem>>, vector<1x128xf32>,
    return
  }
  func.func @transform_0(%arg0: i32) -> (i32, i32) {
    %c0_i32 = arith.constant 0 : i32
    %c0_i32_0 = arith.constant 0 : i32
    return %arg0, %c0_i32 : i32, i32
  }
  func.func @transform_1(%arg0: i32) -> (i32, i32) {
    %c0_i32 = arith.constant 0 : i32
    %c0_i32_0 = arith.constant 0 : i32
    %c0_i32_1 = arith.constant 0 : i32
    return %c0_i32, %c0_i32_0 : i32, i32
  }
  func.func @transform_2(%arg0: i32) -> (i32, i32) {
    %c0_i32 = arith.constant 0 : i32
    %c0_i32_0 = arith.constant 0 : i32
    %c0_i32_1 = arith.constant 0 : i32
    return %c0_i32, %c0_i32_0 : i32, i32
  }
  func.func @transform_3(%arg0: i32) -> (i32, i32) {
    %c0_i32 = arith.constant 0 : i32
    %c0_i32_0 = arith.constant 0 : i32
    %c0_i32_1 = arith.constant 0 : i32
    return %c0_i32, %c0_i32_0 : i32, i32
  }
  func.func @transform_4(%arg0: i32) -> (i32, i32) {
    %c0_i32 = arith.constant 0 : i32
    %c0_i32_0 = arith.constant 0 : i32
    return %c0_i32, %arg0 : i32, i32
  }
}

</mosaic_0001>

<bundles_post_ra>
// kernel: salary_predictor_forward.1
= control target key start
LH: loop header
LB: loop body
LE: loop exit
PB: predicated region body
PF: predicated region fallthrough
CT: control target
= control target key end

     0   :  { %vm102_vm0 = vcmask 1040384   ;;  %v306_v12 = vmov 1.0   ;;  %vm74_vm1 = vcmask 72704   ;;  %vm164_vm2 = vcmask 531456   ;;  %s442_s0 = inlined_call_operand.vmem [shape: f32[128,8], index: 0, kind: input, shape index: {}]   ;;  %s443_s1 = inlined_call_operand.vmem [shape: f32[65,9], index: 1, kind: input, shape index: {}]   ;;  %s444_s2 = inlined_call_operand.vmem [shape: f32[33,65], index: 2, kind: input, shape index: {}]   ;;  %s445_s3 = inlined_call_operand.vmem [shape: f32[1,33], index: 3, kind: input, shape index: {}]   ;;  %s446_s4 = inlined_call_operand.vmem [shape: f32[1,128], index: 4, kind: output, shape index: {}]  }
   0x1   :  { %v17_v0 = vld [vmem:[%s442_s0] sm:$0xff]  ;;  %v18_v1 = vld [vmem:[%s442_s0 + $0x8] sm:$0xff]  ;;  %v19_v2 = vld [vmem:[%s442_s0 + $0x10] sm:$0xff]  ;;  %272 = vmatpush.msk.msra.mxu0 %vm102_vm0, %v306_v12  ;;  %290 = vmatpush.msk.msra.mxu3 %vm102_vm0, %v306_v12  ;;  %vm221_vm3 = vcmask 269312  }
   0x2   :  { %33 = vxpose.xlu0.b32.start [1/16] (narrow) %v17_v0, 8  ;;  %v20_v3 = vld [vmem:[%s442_s0 + $0x18] sm:$0xff]  ;;  %v21_v4 = vld [vmem:[%s442_s0 + $0x20] sm:$0xff]  ;;  %v22_v5 = vld [vmem:[%s442_s0 + $0x28] sm:$0xff] }
   0x3   :  { %v23_v6 = vld [vmem:[%s442_s0 + $0x30] sm:$0xff]  ;;  %v24_v7 = vld [vmem:[%s442_s0 + $0x38] sm:$0xff]  ;;  %v25_v8 = vld [vmem:[%s442_s0 + $0x40] sm:$0xff] }
   0x4   :  { %v26_v9 = vld [vmem:[%s442_s0 + $0x48] sm:$0xff]  ;;  %v27_v10 = vld [vmem:[%s442_s0 + $0x50] sm:$0xff]  ;;  %v28_v11 = vld [vmem:[%s442_s0 + $0x58] sm:$0xff] }
   0x5   :  { %v29_v13 = vld [vmem:[%s442_s0 + $0x60] sm:$0xff]  ;;  %v30_v14 = vld [vmem:[%s442_s0 + $0x68] sm:$0xff]  ;;  %v31_v15 = vld [vmem:[%s442_s0 + $0x70] sm:$0xff] }
   0x6   :  { %v32_v16 = vld [vmem:[%s442_s0 + $0x78] sm:$0xff]  ;;  %v70_v17 = vld [vmem:[%s443_s1 + $0x28] sm:$0xff]  ;;  %v65_v18 = vld [vmem:[%s443_s1] sm:$0xff] }
   0x7   :  { %v71_v20 = vld [vmem:[%s443_s1 + $0x30] sm:$0xff]  ;;  %v66_v21 = vld [vmem:[%s443_s1 + $0x8] sm:$0xff]  ;;  %v72_v22 = vld [vmem:[%s443_s1 + $0x38] sm:$0xff] }
   0x8   :  { %v67_v23 = vld [vmem:[%s443_s1 + $0x10] sm:$0xff]  ;;  %v73_v24 = vld [vmem:[%s443_s1 + $0x40] sm:$0x1]  ;;  %v68_v25 = vld [vmem:[%s443_s1 + $0x18] sm:$0xff] }
   0x9   :  { %v69_v26 = vld [vmem:[%s443_s1 + $0x20] sm:$0xff]  ;;  %v162_v45 = vld [vmem:[%s444_s2 + $0x18] sm:$0xff]  ;;  %v160_v48 = vld [vmem:[%s444_s2 + $0x8] sm:$0xff] }
   0xa   :  { %34 = vxpose.xlu0.b32.cont [2/16] (narrow) %v18_v1, 8  ;;  %v159_v46 = vld [vmem:[%s444_s2] sm:$0xff]  ;;  %v161_v49 = vld [vmem:[%s444_s2 + $0x10] sm:$0xff] }
   0xb   :  { %v163_v47 = vld [vmem:[%s444_s2 + $0x20] sm:$0x1] }
   0xc   :  { %v220_v60 = vld [vmem:[%s445_s3] sm:$0x1] }
  0x12   :  { %35 = vxpose.xlu0.b32.cont [3/16] (narrow) %v19_v2, 8 }
  0x1a   :  { %36 = vxpose.xlu0.b32.cont [4/16] (narrow) %v20_v3, 8 }
  0x22   :  { %37 = vxpose.xlu0.b32.cont [5/16] (narrow) %v21_v4, 8 }
  0x2a   :  { %38 = vxpose.xlu0.b32.cont [6/16] (narrow) %v22_v5, 8 }
  0x32   :  { %39 = vxpose.xlu0.b32.cont [7/16] (narrow) %v23_v6, 8 }
  0x3a   :  { %40 = vxpose.xlu0.b32.cont [8/16] (narrow) %v24_v7, 8 }
  0x42   :  { %41 = vxpose.xlu0.b32.cont [9/16] (narrow) %v25_v8, 8 }
  0x4a   :  { %42 = vxpose.xlu0.b32.cont [10/16] (narrow) %v26_v9, 8 }
  0x52   :  { %43 = vxpose.xlu0.b32.cont [11/16] (narrow) %v27_v10, 8 }
  0x5a   :  { %44 = vxpose.xlu0.b32.cont [12/16] (narrow) %v28_v11, 8 }
  0x62   :  { %45 = vxpose.xlu0.b32.cont [13/16] (narrow) %v29_v13, 8 }
  0x6a   :  { %46 = vxpose.xlu0.b32.cont [14/16] (narrow) %v30_v14, 8 }
  0x72   :  { %47 = vxpose.xlu0.b32.cont [15/16] (narrow) %v31_v15, 8 }
  0x7a   :  { %48 = vxpose.xlu0.b32.end [16/16] (narrow) %v32_v16, 8 }
  0xa6   :  { %v49_v19 = vpop.trf.xlu0 }
  0xa7   :  { %121 = vmatpush.msra.mxu0 %v49_v19  ;;  %291 = vmatpush.msra.mxu3 %v49_v19 }
  0xa8   :  { %278 = vmatmul.msk.f32.vlgmr.msra.gmra.mxu3 %vm74_vm1, %v70_v17  ;;  %273 = vmatmul.msk.f32.vlgmr.msra.gmra.mxu0 %vm74_vm1, %v65_v18 }
  0xb0   :  { %279 = vmatmul.msk.f32.gmra.mxu3 %vm74_vm1, %v71_v20  ;;  %274 = vmatmul.msk.f32.gmra.mxu0 %vm74_vm1, %v66_v21 }
  0xb8   :  { %280 = vmatmul.msk.f32.gmra.mxu3 %vm74_vm1, %v72_v22  ;;  %275 = vmatmul.msk.f32.gmra.mxu0 %vm74_vm1, %v67_v23 }
  0xc0   :  { %281 = vmatmul.msk.f32.gmra.mxu3 %vm74_vm1, %v73_v24  ;;  %276 = vmatmul.msk.f32.gmra.mxu0 %vm74_vm1, %v68_v25 }
  0xc8   :  { %277 = vmatmul.msk.f32.gmra.mxu0 %vm74_vm1, %v69_v26 }
 0x125   :  { %v123_v27 = vpop.f32.mrf.mxu0 }
 0x126   :  { %v150_v44 = vmax.f32 %v123_v27, 0.0 }
 0x12b   :  { %v138_v28 = vpop.f32.mrf.mxu3 }
 0x12c   :  { %v155_v39 = vmax.f32 %v138_v28, 0.0 }
 0x12d   :  { %v126_v29 = vpop.f32.mrf.mxu0 }
 0x12e   :  { %v151_v43 = vmax.f32 %v126_v29, 0.0 }
 0x133   :  { %v141_v30 = vpop.f32.mrf.mxu3 }
 0x134   :  { %v156_v38 = vmax.f32 %v141_v30, 0.0 }
 0x135   :  { %v129_v31 = vpop.f32.mrf.mxu0 }
 0x136   :  { %v152_v42 = vmax.f32 %v129_v31, 0.0 }
 0x13b   :  { %v144_v32 = vpop.f32.mrf.mxu3 }
 0x13c   :  { %v157_v36 = vmax.f32 %v144_v32, 0.0 }
 0x13d   :  { %v132_v33 = vpop.f32.mrf.mxu0 }
 0x13e   :  { %v153_v41 = vmax.f32 %v132_v33, 0.0 }
 0x143   :  { %v147_v34 = vpop.f32.mrf.mxu3 }
 0x144   :  { %v158_v35 = vmax.f32 %v147_v34, 0.0 }
 0x145   :  { %v135_v37 = vpop.f32.mrf.mxu0 }
 0x146   :  { %282 = vmatpush.msk.msra.mxu1 %vm102_vm0, %v158_v35  ;;  %292 = vmatpush.msk.msra.mxu2 %vm102_vm0, %v158_v35  ;;  %v154_v40 = vmax.f32 %v135_v37, 0.0 }
 0x148   :  { %191 = vmatpush.msra.mxu1 %v157_v36  ;;  %293 = vmatpush.msra.mxu2 %v157_v36 }
 0x14a   :  { %192 = vmatpush.msra.mxu1 %v156_v38  ;;  %294 = vmatpush.msra.mxu2 %v156_v38 }
 0x14c   :  { %193 = vmatpush.msra.mxu1 %v155_v39  ;;  %295 = vmatpush.msra.mxu2 %v155_v39 }
 0x14e   :  { %194 = vmatpush.msra.mxu1 %v154_v40  ;;  %296 = vmatpush.msra.mxu2 %v154_v40 }
 0x150   :  { %195 = vmatpush.msra.mxu1 %v153_v41  ;;  %297 = vmatpush.msra.mxu2 %v153_v41 }
 0x152   :  { %196 = vmatpush.msra.mxu1 %v152_v42  ;;  %298 = vmatpush.msra.mxu2 %v152_v42 }
 0x154   :  { %197 = vmatpush.msra.mxu1 %v151_v43  ;;  %299 = vmatpush.msra.mxu2 %v151_v43 }
 0x156   :  { %198 = vmatpush.msra.mxu1 %v150_v44  ;;  %300 = vmatpush.msra.mxu2 %v150_v44 }
 0x157   :  { %286 = vmatmul.msk.f32.vlgmr.msra.gmra.mxu2 %vm164_vm2, %v162_v45  ;;  %283 = vmatmul.msk.f32.vlgmr.msra.gmra.mxu1 %vm164_vm2, %v159_v46 }
 0x15f   :  { %287 = vmatmul.msk.f32.gmra.mxu2 %vm164_vm2, %v163_v47  ;;  %284 = vmatmul.msk.f32.gmra.mxu1 %vm164_vm2, %v160_v48 }
 0x167   :  { %285 = vmatmul.msk.f32.gmra.mxu1 %vm164_vm2, %v161_v49 }
 0x1d4   :  { %v200_v50 = vpop.f32.mrf.mxu1 }
 0x1d5   :  { %v215_v59 = vmax.f32 %v200_v50, 0.0 }
 0x1da   :  { %v209_v51 = vpop.f32.mrf.mxu2 }
 0x1db   :  { %v218_v56 = vmax.f32 %v209_v51, 0.0 }
 0x1dc   :  { %v203_v52 = vpop.f32.mrf.mxu1 }
 0x1dd   :  { %v216_v58 = vmax.f32 %v203_v52, 0.0 }
 0x1e2   :  { %v212_v53 = vpop.f32.mrf.mxu2 }
 0x1e3   :  { %v219_v54 = vmax.f32 %v212_v53, 0.0 }
 0x1e4   :  { %v206_v55 = vpop.f32.mrf.mxu1 }
 0x1e5   :  { %288 = vmatpush.msk.msrb.mxu2 %vm102_vm0, %v219_v54  ;;  %v217_v57 = vmax.f32 %v206_v55, 0.0 }
 0x1e7   :  { %240 = vmatpush.msrb.mxu2 %v218_v56 }
 0x1e9   :  { %241 = vmatpush.msrb.mxu2 %v217_v57 }
 0x1eb   :  { %242 = vmatpush.msrb.mxu2 %v216_v58 }
 0x1ed   :  { %243 = vmatpush.msrb.mxu2 %v215_v59 }
 0x1ee   :  { %289 = vmatmul.msk.f32.vlgmr.msrb.gmra.mxu2 %vm221_vm3, %v220_v60 }
 0x271   :  { %v245_v61 = vpop.f32.mrf.mxu2 }
 0x272   :  { %v248_v62 = vsub.f32 0.0, %v245_v61 }
 0x274   :  { %v249_v63 = vmul.f32 1.442695, %v248_v62 }
 0x276   :  { %302 = vpow2.f32 %v249_v63 }
 0x27c   :  { %v303_v0 = vpop.eup %302 }
 0x27d   :  { %v251_v1 = vadd.f32 1.0, %v303_v0 }
 0x27f   :  { %304 = vrcp.f32 %v251_v1  ;;  %v263_v5 = vand.u32 2147483648, %v251_v1  ;;  %v261_v7 = vand.u32 2147483647, %v251_v1  ;;  %vm257_vm5 = vweird.f32 %v251_v1 }
 0x281   :  { %v264_v9 = vor.u32 1.1754944e-38, %v263_v5  ;;  %vm262_vm7 = vcmp.eq.f32.partialorder %v261_v7, 8.507059e+37 }
 0x285   :  { %v305_v2 = vpop.eup %304 }
 0x286   :  { %v253_v3 = vmul.f32 %v305_v2, %v251_v1  ;;  %vm258_vm4 = vweird.f32 %v305_v2 }
 0x287   :  { %vm259_vm6 = vmor %vm257_vm5, %vm258_vm4 }
 0x288   :  { %v254_v4 = vsub.f32 1.0, %v253_v3 }
 0x28a   :  { %v255_v6 = vmul.f32 %v305_v2, %v254_v4 }
 0x28c   :  { %v256_v8 = vadd.f32 %v305_v2, %v255_v6 }
 0x28e   :  { %v260_v10 = vsel %vm259_vm6, %v305_v2, %v256_v8 }
 0x28f   :  { %v265_v11 = vsel %vm262_vm7, %v264_v9, %v260_v10 }
 0x290   :  { %267 = vst [vmem:[%s446_s4] sm:$0x1] %v265_v11 }

</bundles_post_ra>
